<compile_context>
chip_gen: v7x
topology: tpu7x:2x2x1
jax: 0.10.0
libtpu: 0.0.40
codegen_flags: <defaults>
</compile_context>

<pallas_src>
import jax
import jax.numpy as jnp
from jax import lax
from jax.experimental import pallas as pl
from jax.experimental.pallas import tpu as pltpu


def _valid_channel_tiles(cout: int, h: int):
    """Divisors of Cout whose block keeps the sublane dim (tc*H) legal."""
    return [d for d in range(1, cout + 1)
            if cout % d == 0 and ((d * h) % 8 == 0 or d == cout)]


def channel_to_space(x: jax.Array, upscale_factor: int = 2,
                     vmem_budget_bytes: int = 16 << 20) -> jax.Array:
    """Pallas TPU implementation of ChannelToSpace.forward (NCHW)."""
    bs = int(upscale_factor)
    N, C, H, W = x.shape
    assert C % (bs * bs) == 0, "C must be divisible by upscale_factor**2"
    Cout = C // (bs * bs)
    Hout, Wout = H * bs, W * bs
    Lout = bs * Wout  # lane width of one (c, h) output row group (= bs*bs*W)

    in_dt = jnp.dtype(x.dtype)
    is_bf16 = in_dt == jnp.dtype(jnp.bfloat16)
    cdt = jnp.bfloat16 if is_bf16 else jnp.float32       # compute dtype
    acc_dt = jnp.bfloat16 if is_bf16 else jnp.float32    # matmul result dtype
    prec = lax.Precision.DEFAULT if is_bf16 else lax.Precision.HIGHEST
    # TODO(synk): integer inputs route through the f32 MXU path and are only
    # exact below 2**24; the module is used on float feature maps in DBSR.

    # Free views (pure metadata, no data movement):
    #   input  channel -> (b1, b2, c) split, (c, h) merged into one row axis
    #   output (N, Cout, Hout, Wout) <-> (N, Cout*H, bs*Wout) row-major identity
    x5 = x.reshape(N, bs * bs, Cout * H, W)

    # Lane-scatter operator, one exact 0/1 (W, Wout) slice per b2:
    #   S[b2, w, w*bs + b2] = 1
    wout_idx = jnp.arange(Wout)[None, None, :]
    src_idx = jnp.arange(W)[None, :, None] * bs + jnp.arange(bs)[:, None, None]
    S = (wout_idx == src_idx).astype(cdt)

    # --- VMEM accounting for the channel tile (full per-step residency) -----
    itemsize = in_dt.itemsize
    csize = jnp.dtype(cdt).itemsize
    asize = jnp.dtype(acc_dt).itemsize
    per_tc = H * (2 * bs * bs * W * itemsize      # input block, double-buffered
                  + 2 * Lout * itemsize           # output block, double-buffered
                  + W * csize                     # q operand
                  + (bs + 1) * Wout * asize)      # bs partial rows + concat result
    fixed = 2 * int(S.size) * csize               # scatter operator buffers

    tiles = _valid_channel_tiles(Cout, H)
    fitting = [d for d in tiles if fixed + d * per_tc <= vmem_budget_bytes]
    tc = max(fitting) if fitting else min(tiles)
    # Keep >=2 grid steps when possible so both v7x TensorCores get work.
    if N * (Cout // tc) < 2:
        smaller = [d for d in tiles if d < tc]
        if smaller:
            tc = max(smaller)

    est = fixed + tc * per_tc
    vmem_limit = int(min(64 << 20, max(32 << 20, 2 * est)))

    grid = (N, Cout // tc)

    def kernel(s_ref, x_ref, o_ref):
        pieces = []
        for b1 in range(bs):                      # static, bs is tiny (2)
            acc = None
            for b2 in range(bs):
                # (tc*H, W) slab for this (b1, b2) — assembled by the BlockSpec
                # DMA; no in-kernel concatenates or per-channel slicing.
                q = x_ref[0, b1 * bs + b2].astype(cdt)
                p = lax.dot(q, s_ref[b2], precision=prec,
                            preferred_element_type=acc_dt)   # (tc*H, Wout)
                acc = p if acc is None else acc + p
            pieces.append(acc)
        # One dense, lane-contiguous (tc*H, bs*Wout) store per grid step.
        full = pieces[0] if bs == 1 else jnp.concatenate(pieces, axis=-1)
        o_ref[0] = full.astype(o_ref.dtype)

    out3 = pl.pallas_call(
        kernel,
        out_shape=jax.ShapeDtypeStruct((N, Cout * H, Lout), x.dtype),
        grid=grid,
        in_specs=[
            pl.BlockSpec((bs, W, Wout), lambda n, c: (0, 0, 0)),             # S
            pl.BlockSpec((1, bs * bs, tc * H, W), lambda n, c: (n, 0, c, 0)),  # x
        ],
        out_specs=pl.BlockSpec((1, tc * H, Lout), lambda n, c: (n, c, 0)),
        compiler_params=pltpu.CompilerParams(
            dimension_semantics=("parallel", "parallel"),
            vmem_limit_bytes=vmem_limit),
    )(S, x5)

    # Free reshape: (N, Cout*H, bs*Wout) and (N, Cout, Hout, Wout) share the
    # exact same row-major element order.
    return out3.reshape(N, Cout, Hout, Wout)


def channel_to_space_ref(x: jax.Array, bs: int = 2) -> jax.Array:
    """Pure-JAX reference, mirrors the PyTorch view/permute/view exactly."""
    N, C, H, W = x.shape
    y = x.reshape(N, bs, bs, C // (bs * bs), H, W)
    y = jnp.transpose(y, (0, 3, 4, 1, 5, 2))
    return y.reshape(N, C // (bs * bs), H * bs, W * bs)


if __name__ == "__main__":
    key = jax.random.PRNGKey(0)
    N, C, H, W = 2, 4, 16, 16
    bs = 2
    x = jax.random.normal(key, (N, C, H, W), dtype=jnp.float32)

    out = channel_to_space(x, upscale_factor=bs)
    out = jax.block_until_ready(out)

    ref = channel_to_space_ref(x, bs=bs)
    assert out.shape == ref.shape, (out.shape, ref.shape)
    assert out.dtype == ref.dtype, (out.dtype, ref.dtype)
    assert jnp.allclose(out, ref, atol=1e-6, rtol=1e-6), "mismatch vs reference"

    print("KERNEL_OK")
</pallas_src>

<mosaic_0001>
module attributes {stable_mosaic.version = 11 : i64} {
  func.func @kernel(%arg0: i32, %arg1: i32, %arg2: memref<2x16x32xf32, #tpu.memory_space<vmem>>, %arg3: memref<1x4x16x16xf32, #tpu.memory_space<vmem>>, %arg4: memref<1x16x64xf32, #tpu.memory_space<vmem>>) attributes {dimension_semantics = [#tpu.dimension_semantics<parallel>, #tpu.dimension_semantics<parallel>], iteration_bounds = array<i64: 2, 1>, scalar_prefetch = 0 : i64, scratch_operands = 0 : i64, tpu.core_type = #tpu.core_type<tc>, window_params = [{pipeline_mode = #tpu.pipeline_mode<synchronous>, transform_indices = @transform_0, window_bounds = array<i64: 2, 16, 32>}, {transform_indices = @transform_1, window_bounds = array<i64: 1, 4, 16, 16>}, {transform_indices = @transform_2, window_bounds = array<i64: 1, 16, 64>}]} {
    %c0 = arith.constant 0 : index
    %c0_0 = arith.constant 0 : index
    %c0_1 = arith.constant 0 : index
    %c0_2 = arith.constant 0 : index
    %0 = vector.load %arg3[%c0, %c0_0, %c0_1, %c0_2] : memref<1x4x16x16xf32, #tpu.memory_space<vmem>>, vector<1x1x16x16xf32>
    %1 = vector.shape_cast %0 : vector<1x1x16x16xf32> to vector<16x16xf32>
    %c0_3 = arith.constant 0 : index
    %c0_4 = arith.constant 0 : index
    %c0_5 = arith.constant 0 : index
    %2 = vector.load %arg2[%c0_3, %c0_4, %c0_5] : memref<2x16x32xf32, #tpu.memory_space<vmem>>, vector<1x16x32xf32>
    %3 = vector.shape_cast %2 : vector<1x16x32xf32> to vector<16x32xf32>
    %cst = arith.constant dense<0.000000e+00> : vector<16x32xf32>
    %4 = tpu.matmul %1, %3, %cst {dimension_numbers = #tpu.dot_dimension_numbers<[1], [0], [0], [1], [0, 0, 1, 1], [], []>, precision = #tpu.contract_precision<fp32>} : vector<16x16xf32>, vector<16x32xf32>, vector<16x32xf32> -> vector<16x32xf32>
    %c0_6 = arith.constant 0 : index
    %c1 = arith.constant 1 : index
    %c0_7 = arith.constant 0 : index
    %c0_8 = arith.constant 0 : index
    %5 = vector.load %arg3[%c0_6, %c1, %c0_7, %c0_8] : memref<1x4x16x16xf32, #tpu.memory_space<vmem>>, vector<1x1x16x16xf32>
    %6 = vector.shape_cast %5 : vector<1x1x16x16xf32> to vector<16x16xf32>
    %c1_9 = arith.constant 1 : index
    %c0_10 = arith.constant 0 : index
    %c0_11 = arith.constant 0 : index
    %7 = vector.load %arg2[%c1_9, %c0_10, %c0_11] : memref<2x16x32xf32, #tpu.memory_space<vmem>>, vector<1x16x32xf32>
    %8 = vector.shape_cast %7 : vector<1x16x32xf32> to vector<16x32xf32>
    %cst_12 = arith.constant dense<0.000000e+00> : vector<16x32xf32>
    %9 = tpu.matmul %6, %8, %cst_12 {dimension_numbers = #tpu.dot_dimension_numbers<[1], [0], [0], [1], [0, 0, 1, 1], [], []>, precision = #tpu.contract_precision<fp32>} : vector<16x16xf32>, vector<16x32xf32>, vector<16x32xf32> -> vector<16x32xf32>
    %10 = arith.addf %4, %9 : vector<16x32xf32>
    %c0_13 = arith.constant 0 : index
    %c2 = arith.constant 2 : index
    %c0_14 = arith.constant 0 : index
    %c0_15 = arith.constant 0 : index
    %11 = vector.load %arg3[%c0_13, %c2, %c0_14, %c0_15] : memref<1x4x16x16xf32, #tpu.memory_space<vmem>>, vector<1x1x16x16xf32>
    %12 = vector.shape_cast %11 : vector<1x1x16x16xf32> to vector<16x16xf32>
    %c0_16 = arith.constant 0 : index
    %c0_17 = arith.constant 0 : index
    %c0_18 = arith.constant 0 : index
    %13 = vector.load %arg2[%c0_16, %c0_17, %c0_18] : memref<2x16x32xf32, #tpu.memory_space<vmem>>, vector<1x16x32xf32>
    %14 = vector.shape_cast %13 : vector<1x16x32xf32> to vector<16x32xf32>
    %cst_19 = arith.constant dense<0.000000e+00> : vector<16x32xf32>
    %15 = tpu.matmul %12, %14, %cst_19 {dimension_numbers = #tpu.dot_dimension_numbers<[1], [0], [0], [1], [0, 0, 1, 1], [], []>, precision = #tpu.contract_precision<fp32>} : vector<16x16xf32>, vector<16x32xf32>, vector<16x32xf32> -> vector<16x32xf32>
    %c0_20 = arith.constant 0 : index
    %c3 = arith.constant 3 : index
    %c0_21 = arith.constant 0 : index
    %c0_22 = arith.constant 0 : index
    %16 = vector.load %arg3[%c0_20, %c3, %c0_21, %c0_22] : memref<1x4x16x16xf32, #tpu.memory_space<vmem>>, vector<1x1x16x16xf32>
    %17 = vector.shape_cast %16 : vector<1x1x16x16xf32> to vector<16x16xf32>
    %c1_23 = arith.constant 1 : index
    %c0_24 = arith.constant 0 : index
    %c0_25 = arith.constant 0 : index
    %18 = vector.load %arg2[%c1_23, %c0_24, %c0_25] : memref<2x16x32xf32, #tpu.memory_space<vmem>>, vector<1x16x32xf32>
    %19 = vector.shape_cast %18 : vector<1x16x32xf32> to vector<16x32xf32>
    %cst_26 = arith.constant dense<0.000000e+00> : vector<16x32xf32>
    %20 = tpu.matmul %17, %19, %cst_26 {dimension_numbers = #tpu.dot_dimension_numbers<[1], [0], [0], [1], [0, 0, 1, 1], [], []>, precision = #tpu.contract_precision<fp32>} : vector<16x16xf32>, vector<16x32xf32>, vector<16x32xf32> -> vector<16x32xf32>
    %21 = arith.addf %15, %20 : vector<16x32xf32>
    %22 = tpu.concatenate %10, %21 in 1 : vector<16x32xf32>, vector<16x32xf32> -> vector<16x64xf32>
    %c0_27 = arith.constant 0 : index
    %c0_28 = arith.constant 0 : index
    %c0_29 = arith.constant 0 : index
    %23 = vector.load %arg4[%c0_27, %c0_28, %c0_29] : memref<1x16x64xf32, #tpu.memory_space<vmem>>, vector<1x16x64xf32>
    %24 = vector.shape_cast %23 : vector<1x16x64xf32> to vector<16x64xf32>
    %25 = vector.shape_cast %22 : vector<16x64xf32> to vector<1x16x64xf32>
    tpu.vector_store %arg4[%c0_27, %c0_28, %c0_29], %25 {strides = array<i32>} : memref<1x16x64xf32, #tpu.memory_space<vmem>>, vector<1x16x64xf32>,
    return
  }
  func.func @transform_0(%arg0: i32, %arg1: i32) -> (i32, i32, i32) {
    %c0_i32 = arith.constant 0 : i32
    %c0_i32_0 = arith.constant 0 : i32
    %c0_i32_1 = arith.constant 0 : i32
    %c0_i32_2 = arith.constant 0 : i32
    return %c0_i32, %c0_i32_0, %c0_i32_1 : i32, i32, i32
  }
  func.func @transform_1(%arg0: i32, %arg1: i32) -> (i32, i32, i32, i32) {
    %c0_i32 = arith.constant 0 : i32
    %c0_i32_0 = arith.constant 0 : i32
    %c0_i32_1 = arith.constant 0 : i32
    return %arg0, %c0_i32, %arg1, %c0_i32_0 : i32, i32, i32, i32
  }
  func.func @transform_2(%arg0: i32, %arg1: i32) -> (i32, i32, i32) {
    %c0_i32 = arith.constant 0 : i32
    %c0_i32_0 = arith.constant 0 : i32
    return %arg0, %arg1, %c0_i32 : i32, i32, i32
  }
}

</mosaic_0001>

<bundles_post_ra>
// kernel: tpu_custom_call.1
= control target key start
LH: loop header
LB: loop body
LE: loop exit
PB: predicated region body
PF: predicated region fallthrough
CT: control target
= control target key end

     0   :  { %7 = vsyncpa [#allocation3], 0  ;;  %s3405_s0 = inlined_call_operand.hbm [shape: f32[2,16,32], index: 0, kind: input, shape index: {}]   ;;  %s3406_s1 = inlined_call_operand.hbm [shape: f32[2,4,16,16], index: 1, kind: input, shape index: {}]   ;;  %s3407_s2 = inlined_call_operand.hbm [shape: f32[2,16,64], index: 2, kind: output, shape index: {}]  }
   0x1   :  { %8 = vsyncpa [#allocation6], 0 }
   0x2   :  { %10 = vsyncpa [#allocation6 + $0x1], 0 }
   0x3   :  { %11 = vsyncpa [#allocation4], 0 }
   0x4   :  { %13 = vsyncpa [#allocation4 + $0x1], 0  ;;  %s3051_s9 = smov 0   ;;  %s3053_s10 = smov 0  }
   0x5   :  { %s3055_s11 = smov 0   ;;  %s3057_s12 = smov 0  }
   0x6   :  { %s3059_s13 = smov 0   ;;  %s3061_s14 = smov 0  }
   0x7 LB: > { %s2375_s15 = sadd.s32 4294967295, %s3026_s14   ;;  %s2376_s16 = sadd.s32 4294967294, %s3026_s14   ;;  %s3026_s14 = sphi %s3061_s14, %s19_s14   ;;  %s3022_s13 = sphi %s3059_s13, %s3431_s13   ;;  %s3018_s12 = sphi %s3057_s12, %s3430_s12   ;;  %s3014_s11 = sphi %s3055_s11, %s3429_s11   ;;  %s3010_s10 = sphi %s3053_s10, %s3428_s10   ;;  %s3006_s9 = sphi %s3051_s9, %s3427_s9  }
   0x8   : > { %p74_p0 = scmp.ne.s32.totalorder %s3010_s10, %s3006_s9  ;;  %p3085_p1 = scmp.eq.s32.totalorder %s2375_s15, 0 }
   0x9   : > { %p3089_p2 = scmp.eq.s32.totalorder %s2375_s15, 1  ;;  %p106_p3 = scmp.eq.s32.totalorder %s2376_s16, 1 }
   0xa   : > { %s3412_s17 = scalar_select %p3085_p1, 1, 0 }
   0xb   : > { %s3413_s18 = scalar_select %p3089_p2, 1, 0 }
   0xc   : > { %p3095_p4 = por %p3085_p1, %p74_p0  ;;  %p2377_p5 = scmp.ge.s32.totalorder %s3026_s14, 1 }
   0xd   : > { %p3100_p6 = por %p106_p3, %p74_p0  ;;  %p113_p7 = scmp.lt.s32.totalorder %s3026_s14, 3 }
   0xe   : > { %s3414_s19 = scalar_select %p3095_p4, 1, 0 }
   0xf   : > { %s3415_s20 = scalar_select %p3100_p6, 1, 0 }
  0x10   : > { %p3105_p8 = pnand %p2377_p5, %p113_p7  ;;  %s3028_s22 = smov [#allocation2]  }
  0x11   : > { %s125_s23 = sshll.u32 %s3028_s22, 4  ;;  %s31_s25 = sadd.s32 1, %s3022_s13  ;;  %s126_s23 = int_to_ptr.vmem [resolvable:$true] %s125_s23 }
  0x12   : > { %s3416_s21 = scalar_select %p3105_p8, 1, 0 }
  0x13   : > { %p2812_p9 = pneg %p3105_p8  ;;  %s2882_s28 = scalar_lea.hbm %s3405_s0, 512 }
  0x14   : > { %p2883_p12 = scmp.ne.s32.totalorder %s3405_s0, %s2882_s28  ;;  %p2889_p5 = scmp.lt.u32.totalorder %s2882_s28, %s3405_s0 }
  0x15   : > { %p3114_p11 = pnand %p2812_p9, %p3085_p1 }
  0x17   : > { %p2884_p13 = pneg %p3114_p11 }
  0x19   : > { %p2885_p0 = pnand %p2884_p13, %p2883_p12 }
  0x1b   : > { %p2886_p3 = pneg %p2885_p0 }
  0x1d   : > { %p2891_p7 = pnand %p2889_p5, %p2886_p3 }
  0x1f   : > { %2894 = shalt.err (!%p2891_p7)
}
  0x20   : > { %s2895_s5 = scalar_lea.vmem %s126_s23, 512  ;;  %p2903_p4 = scmp.lt.s32.totalorder %s126_s23, %s126_s23 }
  0x21   : > { %p2896_p9 = scmp.ne.s32.totalorder %s126_s23, %s2895_s5  ;;  %p2904_p1 = scmp.lt.s32.totalorder %s2895_s5, %s2895_s5 }
  0x23   : > { %p2898_p10 = pnand %p2896_p9, %p2884_p13  ;;  %p2905_p8 = por %p2904_p1, %p2903_p4 }
  0x25   : > { %p2899_p6 = pneg %p2898_p10 }
  0x27   : > { %p2906_p2 = pnand %p2905_p8, %p2899_p6 }
  0x29   : > { %2909 = shalt.err (!%p2906_p2)
}
  0x2a   : > { %s3029_s6 = smov 128   ;;  %s3030_s7 = smov 8  }
  0x2b   : > { %2815 = dma.hbm_to_vmem [thread:$0]  (!%p3114_p11), %s3405_s0, 512, %s126_s23, [#allocation3], %s3029_s6, %s3029_s6, %s3030_s7  }
  0x2c   : > { %p33_p1 = scmp.ge.s32.totalorder %s31_s25, 2  ;;  %s61_s16 = sadd.s32 1, %s3014_s11 }
  0x2d   : > { %p68_p2 = scmp.ne.s32.totalorder %s3014_s11, %s3010_s10  ;;  %p69_p4 = scmp.eq.s32.totalorder %s3026_s14, 0 }
  0x2e   : > { %s3433_s25 = smov (%p33_p1, %s31_s25), 0  ;;  %p3419_p8 = scmp.ne.s32.totalorder %s3413_s18, 0 }
  0x2f   : > { %p3144_p6 = por %p69_p4, %p68_p2  ;;  %s56_s26 = ssub.s32 %s3022_s13, %s3433_s25 }
  0x30   : > { %p3150_p10 = por %p3419_p8, %p68_p2  ;;  %p2825_p12 = scmp.lt.s32.totalorder %s3026_s14, 2 }
  0x31   : > { %p59_p11 = scmp.eq.s32.totalorder %s56_s26, 0  ;;  %s139_s23 = sand.u32 1, %s3014_s11  }
  0x32   : > { %s2380_s27 = sshll.u32 %s139_s23, 6  ;;  %s2398_s29 = sshll.u32 %s3022_s13, 10 }
  0x33   : > { %s3159_s28 = scalar_select %p59_p11, %s3014_s11, %s61_s16  }
  0x34   : > { %s3165_s4 = scalar_lea.hbm %s3406_s1, %s2398_s29  ;;  %s143_s18 = scalar_lea.vmem [#allocation5], %s2380_s27 }
  0x35   : > { %s152_s5 = sshll.u32 %s143_s18, 4  ;;  %p3171_p13 = pnand %p2825_p12, %p3144_p6  ;;  %s3167_s5 = int_to_ptr.vmem [resolvable:$true] %s152_s5 }
  0x36   : > { %s3175_s15 = scalar_lea.sflag [#allocation6], %s139_s23  ;;  %s2910_s16 = scalar_lea.hbm %s3165_s4, 1024 }
  0x37   : > { %p2911_p0 = scmp.ne.s32.totalorder %s3165_s4, %s2910_s16  ;;  %p2912_p3 = pneg %p3171_p13 }
  0x38   : > { %s2915_s22 = scalar_lea.hbm %s3406_s1, 2048  ;;  %p2916_p9 = scmp.lt.u32.totalorder %s3165_s4, %s3406_s1 }
  0x39   : > { %p2913_p5 = pnand %p2912_p3, %p2911_p0  ;;  %p2917_p1 = scmp.lt.u32.totalorder %s2915_s22, %s2910_s16 }
  0x3a   : > { %p2919_p4 = scmp.lt.u32.totalorder %s2910_s16, %s3165_s4 }
  0x3b   : > { %p2914_p7 = pneg %p2913_p5  ;;  %p2918_p2 = por %p2917_p1, %p2916_p9 }
  0x3d   : > { %p2920_p6 = por %p2919_p4, %p2918_p2 }
  0x3f   : > { %p2921_p8 = pnand %p2920_p6, %p2914_p7 }
  0x41   : > { %2924 = shalt.err (!%p2921_p8)
}
  0x42   : > { %s2925_s23 = scalar_lea.vmem %s3167_s5, 1024  ;;  %s3031_s3 = smov [#allocation5]  }
  0x43   : > { %p2926_p12 = scmp.ne.s32.totalorder %s3167_s5, %s2925_s23  ;;  %s2930_s18 = sshll.u32 %s3031_s3, 4  ;;  %s2931_s18 = int_to_ptr.vmem [resolvable:$false] %s2930_s18 }
  0x44   : > { %s2932_s26 = scalar_lea.vmem %s2931_s18, 2048  ;;  %p2933_p5 = scmp.lt.s32.totalorder %s3167_s5, %s2931_s18 }
  0x45   : > { %p2928_p11 = pnand %p2926_p12, %p2912_p3  ;;  %p2934_p9 = scmp.lt.s32.totalorder %s2932_s26, %s2925_s23 }
  0x47   : > { %p2929_p0 = pneg %p2928_p11  ;;  %p2935_p1 = por %p2934_p9, %p2933_p5 }
  0x49   : > { %p2936_p2 = pnand %p2935_p1, %p2929_p0 }
  0x4b   : > { %2939 = shalt.err (!%p2936_p2)
}
  0x4c   : > { %2819 = dma.hbm_to_vmem [thread:$0]  (!%p3171_p13), %s3165_s4, 1024, %s3167_s5, %s3175_s15, %s3029_s6, %s3029_s6, %s3030_s7  }
  0x4d   : > { %p3422_p3 = scmp.ne.s32.totalorder %s3416_s21, 0 }
  0x4e   : > { %p3423_p7 = scmp.ne.s32.totalorder (!%p3422_p3), %s3412_s17, 0 }
  0x4f   : > { %164 = sbr.rel (%p3422_p3) target bundleno = 541 (0x21d), region = 28 }
  0x56   : > { %2993 = dma.done.wait (%p3423_p7), [#allocation3], 512  }
  0x57   : > { %2995 = vsyncadd (%p3423_p7), [#allocation3], 4294966784  ;;  %s3213_s16 = sand.u32 1, %s3010_s10   ;;  %p3424_p13 = scmp.ne.s32.totalorder %s3414_s19, 0 }
  0x58   : > { %s2385_s8 = sshll.u32 %s3213_s16, 6  ;;  %s171_s27 = scalar_lea.sflag [#allocation6], %s3213_s16 }
  0x59   : > { %s3217_s22 = scalar_lea.vmem [#allocation5], %s2385_s8 }
  0x5a   : > { %2997 = dma.done.wait (%p3424_p13), %s171_s27, 1024  }
  0x5b   : > { %2999 = vsyncadd (%p3424_p13), %s171_s27, 4294966272  ;;  %vm207_vm0 = vcmask 130048   ;;  %v205_v0 = vld [vmem:[#allocation2 + $0x10] sm:$0xff]  ;;  %v206_v1 = vld [vmem:[#allocation2 + $0x18] sm:$0xff]  ;;  %s3032_s17 = smov 32   ;;  %s2386_s19 = sshll.u32 %s3213_s16, 4 }
  0x5c   : > { %v2391_v2 = vld [vmem:[%s3217_s22 + $0x30] sm:$0xff]  ;;  %v215_v3 = vand.u32 4294901760, %v205_v0  ;;  %v218_v4 = vand.u32 4294901760, %v206_v1  ;;  %v2392_v6 = vld [vmem:[%s3217_s22 + $0x38] sm:$0xff]  ;;  %v199_v44 = vld [vmem:[#allocation2] sm:$0xff]  ;;  %vm2254_vm1 = vcmask 261120  }
  0x5d   : > { %v1231_v5 = vsel %vm207_vm0, %v2391_v2, 0  ;;  %v2387_v7 = vld [vmem:[%s3217_s22 + $0x10] sm:$0xff]  ;;  %v2388_v8 = vld [vmem:[%s3217_s22 + $0x18] sm:$0xff]  ;;  %v1234_v10 = vsel %vm207_vm0, %v2392_v6, 0  ;;  %v200_v45 = vld [vmem:[#allocation2 + $0x8] sm:$0xff]  ;;  %v723_v47 = vand.u32 4294901760, %v199_v44 }
  0x5e   : > { %v3228_v9 = vand.u32 4294901760, %v1231_v5  ;;  %v209_v11 = vsel %vm207_vm0, %v2387_v7, 0  ;;  %v212_v12 = vsel %vm207_vm0, %v2388_v8, 0  ;;  %v3233_v13 = vpack.c.bf16 %v218_v4, %v215_v3  ;;  %v2389_v46 = vld [vmem:[%s3217_s22 + $0x20] sm:$0xff]  ;;  %v2390_v53 = vld [vmem:[%s3217_s22 + $0x28] sm:$0xff]  ;;  %s194_s21 = scalar_lea.vmem [#allocation7], %s2386_s19 }
  0x5f   : > { %v3235_v14 = vand.u32 4294901760, %v1234_v10  ;;  %v303_v15 = vsub.f32 %v205_v0, %v215_v3  ;;  %v310_v16 = vsub.f32 %v206_v1, %v218_v4  ;;  %v3238_v18 = vand.u32 4294901760, %v209_v11  ;;  %v197_v50 = vld [vmem:[%s3217_s22] sm:$0xff]  ;;  %v198_v59 = vld [vmem:[%s3217_s22 + $0x8] sm:$0xff]  ;;  %s2276_s6 = sshll.u32 %s194_s21, 4  ;;  %s2399_s7 = sshll.u32 %s3018_s12, 8  ;;  %s3351_s6 = int_to_ptr.vmem [resolvable:$true] %s2276_s6 }
  0x60   : > { %v1304_v17 = vsub.f32 %v1231_v5, %v3228_v9  ;;  %v3240_v19 = vand.u32 4294901760, %v212_v12  ;;  %2713 = vmatprep.subr.bf16.mxu1 %v3233_v13  ;;  %2665 = vmatprep.subr.bf16.mxu0 %v3233_v13  ;;  %v726_v48 = vand.u32 4294901760, %v200_v45  ;;  %v1739_v49 = vsel %vm207_vm0, %v2389_v46, 0  ;;  %s3356_s15 = scalar_lea.hbm %s3407_s2, %s2399_s7  ;;  %s2261_s29 = scalar_lea.sflag [#allocation4], %s3213_s16 }
  0x61   : > { %v3244_v20 = vsub.f32 %v1234_v10, %v3235_v14  ;;  %v304_v21 = vand.u32 4294901760, %v303_v15  ;;  %v311_v22 = vand.u32 4294901760, %v310_v16  ;;  %2715 = vmatpush3.bf16.msra.mxu1 %v3233_v13  ;;  %2667 = vmatpush3.bf16.msra.mxu0 %v3233_v13  ;;  %v282_v24 = vsub.f32 %v209_v11, %v3238_v18  ;;  %s2940_s30 = scalar_lea.vmem %s3351_s6, 256  ;;  %s3033_s12 = smov [#allocation7]  }
  0x62   : > { %v1305_v23 = vand.u32 4294901760, %v1304_v17  ;;  %v3251_v25 = vsub.f32 %v212_v12, %v3240_v19  ;;  %v2672_v40 = vpack.c.bf16 %v310_v16, %v303_v15  ;;  %v3270_v51 = vand.u32 4294901760, %v1739_v49  ;;  %p2941_p4 = scmp.ne.s32.totalorder %s3351_s6, %s2940_s30  ;;  %s2944_s23 = sshll.u32 %s3033_s12, 4  ;;  %s2945_s23 = int_to_ptr.vmem [resolvable:$false] %s2944_s23 }
  0x63   : > { %v1315_v26 = vand.u32 4294901760, %v3244_v20  ;;  %v305_v27 = vsub.f32 %v303_v15, %v304_v21  ;;  %v312_v28 = vsub.f32 %v310_v16, %v311_v22  ;;  %v283_v30 = vand.u32 4294901760, %v282_v24  ;;  %s2946_s3 = scalar_lea.vmem %s2945_s23, 512  ;;  %p2947_p12 = scmp.lt.s32.totalorder %s3351_s6, %s2945_s23 }
  0x64   : > { %v1306_v29 = vsub.f32 %v1304_v17, %v1305_v23  ;;  %v293_v31 = vand.u32 4294901760, %v3251_v25  ;;  %v2680_v43 = vpack.c.bf16 %v311_v22, %v304_v21  ;;  %v717_v52 = vsel %vm207_vm0, %v197_v50, 0  ;;  %p2942_p6 = pnand %p2941_p4, %p3150_p10  ;;  %p2948_p11 = scmp.lt.s32.totalorder %s2946_s3, %s2940_s30 }
  0x65   : > { %v1316_v32 = vsub.f32 %v3244_v20, %v1315_v26  ;;  %v306_v33 = vand.u32 4294901760, %v305_v27  ;;  %v313_v34 = vand.u32 4294901760, %v312_v28  ;;  %v284_v36 = vsub.f32 %v282_v24, %v283_v30 }
  0x66   : > { %v1307_v35 = vand.u32 4294901760, %v1306_v29  ;;  %v294_v37 = vsub.f32 %v3251_v25, %v293_v31  ;;  %v3274_v54 = vsub.f32 %v199_v44, %v723_v47  ;;  %v3276_v55 = vsub.f32 %v200_v45, %v726_v48  ;;  %p2943_p8 = pneg %p2942_p6  ;;  %p2949_p0 = por %p2948_p11, %p2947_p12 }
  0x67   : > { %v1317_v38 = vand.u32 4294901760, %v1316_v32  ;;  %v2668_v39 = vpack.c.bf16 %v313_v34, %v306_v33  ;;  %v285_v41 = vand.u32 4294901760, %v284_v36  ;;  %v3278_v56 = vand.u32 4294901760, %v717_v52 }
  0x68   : > { %2584 = vmatprep.mubr.f32.mxu1 %v1307_v35  ;;  %v295_v42 = vand.u32 4294901760, %v294_v37  ;;  %v3282_v57 = vsub.f32 %v1739_v49, %v3270_v51  ;;  %v1742_v58 = vsel %vm207_vm0, %v2390_v53, 0  ;;  %v812_v60 = vand.u32 4294901760, %v3274_v54  ;;  %p2950_p5 = pnand %p2949_p0, %p2943_p8 }
  0x69   : > { %2585 = vmatmul.mubr.f32.vlgmr.msra.gmra.mrb[0].mxu1 %v1317_v38  ;;  %2717 = vmatprep.subr.bf16.mxu1 %v2668_v39  ;;  %v819_v61 = vand.u32 4294901760, %v3276_v55  ;;  %v3289_v62 = vand.u32 4294901760, %v1742_v58  ;;  %v3293_v63 = vsub.f32 %v717_v52, %v3278_v56  ;;  %v720_v0 = vsel %vm207_vm0, %v198_v59, 0 }
  0x6a   : > { %2719 = vmatpush3.bf16.msra.mxu1 %v2668_v39  ;;  %2591 = vmatprep.mubr.f32.mxu1 %v3228_v9  ;;  %v1813_v1 = vand.u32 4294901760, %v3282_v57  ;;  %v3298_v2 = vpack.c.bf16 %v726_v48, %v723_v47  ;;  %v813_v3 = vsub.f32 %v3274_v54, %v812_v60  ;;  %v3304_v5 = vand.u32 4294901760, %v720_v0 }
  0x6b   : > { %2721 = vmatprep.subr.bf16.mxu1 %v2672_v40  ;;  %2500 = vmatprep.mubr.f32.mxu0 %v285_v41  ;;  %v820_v4 = vsub.f32 %v3276_v55, %v819_v61  ;;  %v1822_v6 = vsub.f32 %v1742_v58, %v3289_v62  ;;  %v791_v7 = vand.u32 4294901760, %v3293_v63  ;;  %vm2257_vm2 = vcmask 523264  }
  0x6c   : > { %2501 = vmatmul.mubr.f32.vlgmr.msra.gmra.mrb[0].mxu0 %v295_v42  ;;  %2669 = vmatprep.subr.bf16.mxu0 %v2668_v39  ;;  %v1814_v8 = vsub.f32 %v3282_v57, %v1813_v1  ;;  %v814_v10 = vand.u32 4294901760, %v813_v3  ;;  %v800_v12 = vsub.f32 %v720_v0, %v3304_v5 }
  0x6d   : > { %2671 = vmatpush3.bf16.msra.mxu0 %v2668_v39  ;;  %2507 = vmatprep.mubr.f32.mxu0 %v3238_v18  ;;  %v821_v11 = vand.u32 4294901760, %v820_v4  ;;  %v1823_v15 = vand.u32 4294901760, %v1822_v6  ;;  %v792_v16 = vsub.f32 %v3293_v63, %v791_v7 }
  0x6e   : > { %2673 = vmatprep.subr.bf16.mxu0 %v2672_v40 }
  0x6f   : > { %v1824_v21 = vsub.f32 %v1822_v6, %v1823_v15  ;;  %v793_v22 = vand.u32 4294901760, %v792_v16 }
  0x71   : > { %2592 = vmatmul.mubr.f32.vlgmr.msra.gmra.mrb[0].mxu1 %v3235_v14 }
  0x72   : > { %2723 = vmatpush3.bf16.msra.mxu1 %v2672_v40  ;;  %2598 = vmatprep.mubr.f32.mxu1 %v1304_v17  ;;  %v1815_v17 = vand.u32 4294901760, %v1814_v8 }
  0x73   : > { %2725 = vmatprep.subr.bf16.mxu1 %v3233_v13 }
  0x74   : > { %2508 = vmatmul.mubr.f32.vlgmr.msra.gmra.mrb[0].mxu0 %v3240_v19 }
  0x75   : > { %2675 = vmatpush3.bf16.msra.mxu0 %v2672_v40  ;;  %2514 = vmatprep.mubr.f32.mxu0 %v282_v24 }
  0x76   : > { %2677 = vmatprep.subr.bf16.mxu0 %v3233_v13 }
  0x79   : > { %2599 = vmatmul.mubr.f32.vlgmr.msra.gmra.mrb[0].mxu1 %v3244_v20  ;;  %v801_v20 = vand.u32 4294901760, %v800_v12 }
  0x7a   : > { %2727 = vmatpush3.bf16.msra.mxu1 %v3233_v13  ;;  %2605 = vmatprep.mubr.f32.mxu1 %v1305_v23  ;;  %v1825_v23 = vand.u32 4294901760, %v1824_v21 }
  0x7b   : > { %2729 = vmatprep.subr.bf16.mxu1 %v2680_v43 }
  0x7c   : > { %2515 = vmatmul.mubr.f32.vlgmr.msra.gmra.mrb[0].mxu0 %v3251_v25 }
  0x7d   : > { %2679 = vmatpush3.bf16.msra.mxu0 %v3233_v13  ;;  %2521 = vmatprep.mubr.f32.mxu0 %v283_v30 }
  0x7e   : > { %2681 = vmatprep.subr.bf16.mxu0 %v2680_v43 }
  0x81   : > { %2606 = vmatmul.mubr.f32.vlgmr.msra.gmra.mrb[0].mxu1 %v1315_v26 }
  0x82   : > { %2731 = vmatpush3.bf16.msra.mxu1 %v2680_v43  ;;  %2612 = vmatprep.mubr.f32.mxu1 %v3228_v9 }
  0x83   : > { %2733 = vmatprep.subr.bf16.mxu1 %v3233_v13 }
  0x84   : > { %2522 = vmatmul.mubr.f32.vlgmr.msra.gmra.mrb[0].mxu0 %v293_v31 }
  0x85   : > { %2683 = vmatpush3.bf16.msra.mxu0 %v2680_v43  ;;  %2528 = vmatprep.mubr.f32.mxu0 %v3238_v18 }
  0x86   : > { %2685 = vmatprep.subr.bf16.mxu0 %v3233_v13 }
  0x89   : > { %2613 = vmatmul.mubr.f32.vlgmr.msra.gmra.mrb[0].mxu1 %v3235_v14 }
  0x8a   : > { %2735 = vmatpush3.bf16.msra.mxu1 %v3233_v13  ;;  %2619 = vmatprep.mubr.f32.mxu1 %v3228_v9  ;;  %v2692_v9 = vpack.c.bf16 %v821_v11, %v814_v10 }
  0x8b   : > { %2737 = vmatprep.subr.bf16.mxu1 %v3298_v2 }
  0x8c   : > { %2529 = vmatmul.mubr.f32.vlgmr.msra.gmra.mrb[0].mxu0 %v3240_v19 }
  0x8d   : > { %2687 = vmatpush3.bf16.msra.mxu0 %v3233_v13  ;;  %2535 = vmatprep.mubr.f32.mxu0 %v3238_v18  ;;  %v802_v13 = vsub.f32 %v800_v12, %v801_v20  ;;  %v2696_v18 = vpack.c.bf16 %v3276_v55, %v3274_v54 }
  0x8e   : > { %2689 = vmatprep.subr.bf16.mxu0 %v3298_v2 }
  0x8f   : > { %v803_v24 = vand.u32 4294901760, %v802_v13 }
  0x91   : > { %2620 = vmatmul.mubr.f32.vlgmr.msra.gmra.mrb[0].mxu1 %v3235_v14  ;;  %v2704_v14 = vpack.c.bf16 %v819_v61, %v812_v60 }
  0x92   : > { %2739 = vmatpush3.bf16.msra.mxu1 %v3298_v2  ;;  %2626 = vmatprep.mubr.f32.mxu1 %v1815_v17 }
  0x93   : > { %2741 = vmatprep.subr.bf16.mxu1 %v2692_v9 }
  0x94   : > { %2536 = vmatmul.mubr.f32.vlgmr.msra.gmra.mrb[0].mxu0 %v3240_v19 }
  0x95   : > { %2691 = vmatpush3.bf16.msra.mxu0 %v3298_v2  ;;  %2542 = vmatprep.mubr.f32.mxu0 %v793_v22 }
  0x96   : > { %2693 = vmatprep.subr.bf16.mxu0 %v2692_v9 }
  0x99   : > { %2627 = vmatmul.mubr.f32.vlgmr.msra.gmra.mrb[0].mxu1 %v1825_v23 }
  0x9a   : > { %2743 = vmatpush3.bf16.msra.mxu1 %v2692_v9  ;;  %2633 = vmatprep.mubr.f32.mxu1 %v3270_v51 }
  0x9b   : > { %2745 = vmatprep.subr.bf16.mxu1 %v2696_v18 }
  0x9c   : > { %2543 = vmatmul.mubr.f32.vlgmr.msra.gmra.mrb[0].mxu0 %v803_v24 }
  0x9d   : > { %2695 = vmatpush3.bf16.msra.mxu0 %v2692_v9  ;;  %2549 = vmatprep.mubr.f32.mxu0 %v3278_v56 }
  0x9e   : > { %2697 = vmatprep.subr.bf16.mxu0 %v2696_v18 }
  0xa1   : > { %2634 = vmatmul.mubr.f32.vlgmr.msra.gmra.mrb[0].mxu1 %v3289_v62 }
  0xa2   : > { %2747 = vmatpush3.bf16.msra.mxu1 %v2696_v18  ;;  %2640 = vmatprep.mubr.f32.mxu1 %v3282_v57 }
  0xa3   : > { %2749 = vmatprep.subr.bf16.mxu1 %v3298_v2 }
  0xa4   : > { %2550 = vmatmul.mubr.f32.vlgmr.msra.gmra.mrb[0].mxu0 %v3304_v5 }
  0xa5   : > { %2699 = vmatpush3.bf16.msra.mxu0 %v2696_v18  ;;  %2556 = vmatprep.mubr.f32.mxu0 %v3293_v63 }
  0xa6   : > { %2701 = vmatprep.subr.bf16.mxu0 %v3298_v2 }
  0xa9   : > { %2641 = vmatmul.mubr.f32.vlgmr.msra.gmra.mrb[0].mxu1 %v1822_v6 }
  0xaa   : > { %2751 = vmatpush3.bf16.msra.mxu1 %v3298_v2  ;;  %2647 = vmatprep.mubr.f32.mxu1 %v1813_v1 }
  0xab   : > { %2753 = vmatprep.subr.bf16.mxu1 %v2704_v14 }
  0xac   : > { %2557 = vmatmul.mubr.f32.vlgmr.msra.gmra.mrb[0].mxu0 %v800_v12 }
  0xad   : > { %2703 = vmatpush3.bf16.msra.mxu0 %v3298_v2  ;;  %2563 = vmatprep.mubr.f32.mxu0 %v791_v7 }
  0xae   : > { %2705 = vmatprep.subr.bf16.mxu0 %v2704_v14 }
  0xb1   : > { %2648 = vmatmul.mubr.f32.vlgmr.msra.gmra.mrb[0].mxu1 %v1823_v15 }
  0xb2   : > { %2755 = vmatpush3.bf16.msra.mxu1 %v2704_v14  ;;  %2654 = vmatprep.mubr.f32.mxu1 %v3270_v51 }
  0xb3   : > { %2757 = vmatprep.subr.bf16.mxu1 %v3298_v2 }
  0xb4   : > { %2564 = vmatmul.mubr.f32.vlgmr.msra.gmra.mrb[0].mxu0 %v801_v20 }
  0xb5   : > { %2707 = vmatpush3.bf16.msra.mxu0 %v2704_v14  ;;  %2570 = vmatprep.mubr.f32.mxu0 %v3278_v56 }
  0xb6   : > { %2709 = vmatprep.subr.bf16.mxu0 %v3298_v2 }
  0xb9   : > { %2655 = vmatmul.mubr.f32.vlgmr.msra.gmra.mrb[0].mxu1 %v3289_v62 }
  0xba   : > { %2759 = vmatpush3.bf16.msra.mxu1 %v3298_v2  ;;  %2661 = vmatprep.mubr.f32.mxu1 %v3270_v51 }
  0xbc   : > { %2571 = vmatmul.mubr.f32.vlgmr.msra.gmra.mrb[0].mxu0 %v3304_v5 }
  0xbd   : > { %2711 = vmatpush3.bf16.msra.mxu0 %v3298_v2  ;;  %2577 = vmatprep.mubr.f32.mxu0 %v3278_v56 }
  0xc1   : > { %2662 = vmatmul.mubr.f32.vlgmr.msra.gmra.mrb[0].mxu1 %v3289_v62 }
  0xc4   : > { %2578 = vmatmul.mubr.f32.vlgmr.msra.gmra.mrb[0].mxu0 %v3304_v5 }
 0x194   : > { %v2663_v19 = vpop.f32.mrb[0].mxu1 }
 0x195   : > { %v2236_v25 = vpop.f32.mrb[1].mxu1 }
 0x196   : > { %2248 = vrot.lane.b32.xlu0 %v2236_v25, %s3032_s17 }
 0x197   : > { %v2579_v26 = vpop.f32.mrb[0].mxu0 }
 0x198   : > { %v1214_v27 = vpop.f32.mrb[1].mxu0 }
 0x19a   : > { %2250 = vrot.lane.b32.xlu0 %v2663_v19, %s3032_s17 }
 0x208   : > { %v2249_v28 = vpop.permute.xlu0 %2248 }
 0x209   : > { %v2255_v29 = vsel %vm2254_vm1, %v1214_v27, %v2249_v28 }
 0x20a   : > { %2258 = vst.msk [vmem:[%s194_s21] sm:$0xff] %vm2257_vm2, %v2255_v29 }
 0x20c   : > { %v2251_v30 = vpop.permute.xlu0 %2250 }
 0x20d   : > { %v2256_v31 = vsel %vm2254_vm1, %v2579_v26, %v2251_v30 }
 0x20e   : > { %2259 = vst.msk [vmem:[%s194_s21 + $0x8] sm:$0xff] %vm2257_vm2, %v2256_v31 }
 0x20f   : > { %2953 = shalt.err (!%p2950_p5)
}
 0x210   : > { %s2954_s18 = scalar_lea.hbm %s3356_s15, 256  ;;  %s2958_s27 = scalar_lea.hbm %s3407_s2, 512 }
 0x211   : > { %p2955_p9 = scmp.ne.s32.totalorder %s3356_s15, %s2954_s18  ;;  %p2959_p3 = scmp.lt.u32.totalorder %s3356_s15, %s3407_s2 }
 0x212   : > { %p2960_p7 = scmp.lt.u32.totalorder %s2958_s27, %s2954_s18  ;;  %p2962_p4 = scmp.lt.u32.totalorder %s2954_s18, %s3356_s15 }
 0x213   : > { %p2956_p1 = pnand %p2955_p9, %p3150_p10 }
 0x214   : > { %p2961_p13 = por %p2960_p7, %p2959_p3 }
 0x215   : > { %p2957_p2 = pneg %p2956_p1 }
 0x216   : > { %p2963_p6 = por %p2962_p4, %p2961_p13 }
 0x218   : > { %p2964_p8 = pnand %p2963_p6, %p2957_p2 }
 0x21a   : > { %2967 = shalt.err (!%p2964_p8)
}
 0x21b   : > { %s3034_s19 = smov 128   ;;  %s3035_s21 = smov 8  }
 0x21c   : > { %2810 = dma.vmem_to_hbm [thread:$0]  (%p3150_p10), %s3351_s6, 256, %s3356_s15, %s2261_s29, %s3034_s19, %s3034_s19, %s3035_s21  }
 0x21d PF: > { %s2291_s7 = sand.u32 1, %s3006_s9   ;;  %p3425_p12 = scmp.ne.s32.totalorder %s3415_s20, 0 }
 0x21e   : > { %p3426_p11 = scmp.ge.s32.totalorder %s3026_s14, 2  ;;  %s2292_s4 = scalar_lea.sflag [#allocation4], %s2291_s7 }
 0x220   : > { %p2821_p0 = pnand %p3426_p11, %p3425_p12 }
 0x222   : > { %3001 = dma.done.wait (!%p2821_p0), %s2292_s4, 256  }
 0x223   : > { %3003 = vsyncadd (!%p2821_p0), %s2292_s4, 4294967040  ;;  %s19_s14 = sadd.s32 1, %s3026_s14   ;;  %s3427_s9 = smov %s3010_s10 }
 0x224   : > { %p16_p5 = scmp.ge.s32.totalorder %s19_s14, 4   ;;  %s3428_s10 = smov %s3014_s11 }
 0x225   : > { %s3429_s11 = smov %s3159_s28  ;;  %s3430_s12 = smov %s3022_s13 }
 0x226   : > { %s3431_s13 = smov %s3433_s25  ;;  %18 = sbr.rel (!%p16_p5) target bundleno = 7 (0x7), region = 82 }
 0x22d   :  { %2297 = vsyncpa [#allocation3], 1 }
 0x22e   :  { %2299 = vsyncpa [#allocation3 + $0x1], 1 }
 0x22f   :  { %2300 = vsyncpa [#allocation6], 1 }
 0x230   :  { %2302 = vsyncpa [#allocation6 + $0x1], 1 }
 0x231   :  { %2303 = vsyncpa [#allocation4], 1 }
 0x232   :  { %2305 = vsyncpa [#allocation4 + $0x1], 1 }

</bundles_post_ra>
